<compile_context>
chip_gen: v5e
topology: v5e:2x2
jax: 0.10.0
libtpu: 0.0.40
codegen_flags: <defaults>
</compile_context>

<pallas_src>
import functools

import jax
import jax.numpy as jnp
from jax import lax
from jax.experimental import pallas as pl
from jax.experimental.pallas import tpu as pltpu


def _round_up(x: int, m: int) -> int:
    return ((x + m - 1) // m) * m


def _dropconnect_linear_kernel(*refs, masked: bool, keep_threshold: int,
                               inv_keep: float, compute_dtype):
    """Tiled x @ W_drop^T + b with DropConnect mask applied to the W tile."""
    if masked:
        x_ref, w_ref, bits_ref, b_ref, o_ref, acc_ref = refs
    else:
        x_ref, w_ref, b_ref, o_ref, acc_ref = refs
        bits_ref = None

    k = pl.program_id(2)

    @pl.when(k == 0)
    def _():
        acc_ref[...] = jnp.zeros_like(acc_ref)

    x = x_ref[...]
    w = w_ref[...]

    if masked:
        # keep with probability (1 - p): one unsigned compare per weight.
        keep = bits_ref[...] >= jnp.uint32(keep_threshold)
        w = jnp.where(keep, w, jnp.zeros_like(w))

    if compute_dtype is not None:
        if x.dtype != compute_dtype:
            x = x.astype(compute_dtype)
        if w.dtype != compute_dtype:
            w = w.astype(compute_dtype)

    # Contract K of x (dim 1) against K of w (dim 1): no w.T materialization.
    acc_ref[...] += lax.dot_general(
        x, w,
        dimension_numbers=(((1,), (1,)), ((), ())),
        preferred_element_type=jnp.float32)

    @pl.when(k == pl.num_programs(2) - 1)
    def _():
        acc = acc_ref[...]
        if masked:
            acc = acc * jnp.float32(inv_keep)   # survivor scale, once per tile
        bias = b_ref[...]
        if bias.dtype != jnp.float32:
            bias = bias.astype(jnp.float32)
        o_ref[...] = (acc + bias).astype(o_ref.dtype)


def dropconnect_linear(x, w, b, key, *, dropout: float, training: bool,
                       tm: int = 256, tn: int = 512, tk: int = 512,
                       compute_dtype=None):
    """x: (M,K), w: (N,K) (PyTorch Linear layout), b: (N,) -> (M,N)."""
    assert x.ndim == 2 and w.ndim == 2 and b.ndim == 1
    M, K = x.shape
    N, K2 = w.shape
    assert K == K2 and b.shape[0] == N
    assert 0.0 <= dropout < 1.0, "dropout must be in [0, 1)"

    masked = bool(training) and dropout > 0.0

    # Clamp tiles to (padded) array extents; keep (8,128) alignment.
    tm = min(tm, _round_up(M, 8))
    tn = min(tn, _round_up(N, 128))
    tk = min(tk, _round_up(K, 128))
    Mp, Np, Kp = _round_up(M, tm), _round_up(N, tn), _round_up(K, tk)

    xp = jnp.pad(x, ((0, Mp - M), (0, Kp - K))) if (Mp, Kp) != (M, K) else x
    wp = jnp.pad(w, ((0, Np - N), (0, Kp - K))) if (Np, Kp) != (N, K) else w
    bp = (jnp.pad(b, (0, Np - N)) if Np != N else b).reshape(1, Np)

    grid = (Mp // tm, Np // tn, Kp // tk)

    in_specs = [
        pl.BlockSpec((tm, tk), lambda i, j, k: (i, k)),   # x tile
        pl.BlockSpec((tn, tk), lambda i, j, k: (j, k)),   # W tile (NT layout)
    ]
    operands = [xp, wp]

    keep_threshold = 0
    inv_keep = 1.0
    if masked:
        # Mask is a pure function of (key, padded W shape) -> reproducible
        # across grid order / megacore assignment / repeated tile visits.
        bits = jax.random.bits(key, (Np, Kp), dtype=jnp.uint32)
        in_specs.append(pl.BlockSpec((tn, tk), lambda i, j, k: (j, k)))
        operands.append(bits)
        keep_threshold = min(int(round(dropout * 4294967296.0)), 4294967295)
        inv_keep = 1.0 / (1.0 - dropout)

    in_specs.append(pl.BlockSpec((1, tn), lambda i, j, k: (0, j)))  # bias
    operands.append(bp)

    kernel = functools.partial(
        _dropconnect_linear_kernel,
        masked=masked,
        keep_threshold=keep_threshold,
        inv_keep=inv_keep,
        compute_dtype=compute_dtype)

    out = pl.pallas_call(
        kernel,
        out_shape=jax.ShapeDtypeStruct((Mp, Np), x.dtype),
        grid=grid,
        in_specs=in_specs,
        out_specs=pl.BlockSpec((tm, tn), lambda i, j, k: (i, j)),
        scratch_shapes=[pltpu.VMEM((tm, tn), jnp.float32)],
        compiler_params=pltpu.CompilerParams(
            dimension_semantics=("parallel", "parallel", "arbitrary"),
            vmem_limit_bytes=48 * 1024 * 1024),
    )(*operands)

    if (Mp, Np) != (M, N):
        out = out[:M, :N]
    return out


def dropconnect_linear_ref(x, w, b, key, *, dropout: float, training: bool,
                           tn: int = 512, tk: int = 512):
    """Pure-JAX reference mirroring the kernel's mask construction."""
    if not training or dropout == 0.0:
        return x @ w.T + b[None, :]
    N, K = w.shape
    Np = _round_up(N, min(tn, _round_up(N, 128)))
    Kp = _round_up(K, min(tk, _round_up(K, 128)))
    bits = jax.random.bits(key, (Np, Kp), dtype=jnp.uint32)[:N, :K]
    thr = jnp.uint32(min(int(round(dropout * 4294967296.0)), 4294967295))
    keep = bits >= thr
    w_drop = jnp.where(keep, w, 0.0) * (1.0 / (1.0 - dropout))
    return x @ w_drop.T + b[None, :]


if __name__ == "__main__":
    # Small shapes implied by the wrapped Linear: batch=2, seq=8, hidden=32.
    batch, seq, hidden = 2, 8, 32
    dropout_p = 0.25

    root = jax.random.PRNGKey(0)
    kx, kw, kb, kmask = jax.random.split(root, 4)

    x = jax.random.normal(kx, (batch, seq, hidden), dtype=jnp.float32)
    # PyTorch Linear layout: (out_features, in_features).
    w = jax.random.normal(kw, (hidden, hidden), dtype=jnp.float32) * 0.1
    b = jax.random.normal(kb, (hidden,), dtype=jnp.float32) * 0.1

    x2d = x.reshape(batch * seq, hidden)

    # Training mode: DropConnect active.
    y_train = dropconnect_linear(x2d, w, b, kmask,
                                 dropout=dropout_p, training=True)
    y_train = jax.block_until_ready(y_train)

    # Eval mode: identity dropout -> plain linear.
    y_eval = dropconnect_linear(x2d, w, b, kmask,
                                dropout=dropout_p, training=False)
    y_eval = jax.block_until_ready(y_eval)

    # bf16-operand path (MXU-friendly), f32 accumulation.
    y_bf16 = dropconnect_linear(x2d, w, b, kmask,
                                dropout=dropout_p, training=False,
                                compute_dtype=jnp.bfloat16)
    y_bf16 = jax.block_until_ready(y_bf16)

    y_ref_eval = x2d @ w.T + b[None, :]
    y_ref_train = dropconnect_linear_ref(x2d, w, b, kmask,
                                         dropout=dropout_p, training=True)

    assert y_train.shape == (batch * seq, hidden)
    assert jnp.all(jnp.isfinite(y_train))
    assert jnp.allclose(y_eval, y_ref_eval, atol=1e-5, rtol=1e-5), "eval mismatch"
    assert jnp.allclose(y_train, y_ref_train, atol=1e-4, rtol=1e-4), "train mismatch"
    assert jnp.allclose(y_bf16, y_ref_eval, atol=5e-2, rtol=5e-2), "bf16 mismatch"

    print("KERNEL_OK")
</pallas_src>

<mosaic_0001>
module attributes {stable_mosaic.version = 11 : i64} {
  func.func @_dropconnect_linear_kernel(%arg0: i32, %arg1: i32, %arg2: i32, %arg3: memref<16x128xf32, #tpu.memory_space<vmem>>, %arg4: memref<128x128xf32, #tpu.memory_space<vmem>>, %arg5: memref<128x128xi32, #tpu.memory_space<vmem>>, %arg6: memref<1x128xf32, #tpu.memory_space<vmem>>, %arg7: memref<16x128xf32, #tpu.memory_space<vmem>>, %arg8: memref<16x128xf32, #tpu.memory_space<vmem>>) attributes {dimension_semantics = [#tpu.dimension_semantics<parallel>, #tpu.dimension_semantics<parallel>, #tpu.dimension_semantics<arbitrary>], iteration_bounds = array<i64: 1, 1, 1>, scalar_prefetch = 0 : i64, scratch_operands = 1 : i64, tpu.core_type = #tpu.core_type<tc>, window_params = [{transform_indices = @transform_0, window_bounds = array<i64: 16, 128>}, {transform_indices = @transform_1, window_bounds = array<i64: 128, 128>}, {transform_indices = @transform_2, window_bounds = array<i64: 128, 128>}, {transform_indices = @transform_3, window_bounds = array<i64: 1, 128>}, {transform_indices = @transform_4, window_bounds = array<i64: 16, 128>}]} {
    %c0_i32 = arith.constant 0 : i32
    %0 = arith.cmpi eq, %arg2, %c0_i32 : i32
    %1 = arith.extui %0 : i1 to i32
    %c0_i32_0 = arith.constant 0 : i32
    %2 = arith.cmpi ne, %1, %c0_i32_0 : i32
    scf.if %2 {
      %cst_13 = arith.constant 0.000000e+00 : f32
      %17 = vector.broadcast %cst_13 : f32 to vector<16x128xf32>
      %c0_14 = arith.constant 0 : index
      %c0_15 = arith.constant 0 : index
      %18 = vector.load %arg8[%c0_14, %c0_15] : memref<16x128xf32, #tpu.memory_space<vmem>>, vector<16x128xf32>
      tpu.vector_store %arg8[%c0_14, %c0_15], %17 {strides = array<i32>} : memref<16x128xf32, #tpu.memory_space<vmem>>, vector<16x128xf32>,
    } else {
    }
    %c0 = arith.constant 0 : index
    %c0_1 = arith.constant 0 : index
    %3 = vector.load %arg3[%c0, %c0_1] : memref<16x128xf32, #tpu.memory_space<vmem>>, vector<16x128xf32>
    %c0_2 = arith.constant 0 : index
    %c0_3 = arith.constant 0 : index
    %4 = vector.load %arg4[%c0_2, %c0_3] : memref<128x128xf32, #tpu.memory_space<vmem>>, vector<128x128xf32>
    %c0_4 = arith.constant 0 : index
    %c0_5 = arith.constant 0 : index
    %5 = vector.load %arg5[%c0_4, %c0_5] : memref<128x128xi32, #tpu.memory_space<vmem>>, vector<128x128xi32>
    %c1073741824_i32 = arith.constant 1073741824 : i32
    %6 = vector.broadcast %c1073741824_i32 : i32 to vector<128x128xi32>
    %7 = arith.cmpi uge, %5, %6 : vector<128x128xi32>
    %cst = arith.constant 0.000000e+00 : f32
    %8 = vector.broadcast %cst : f32 to vector<128x128xf32>
    %9 = arith.select %7, %4, %8 : vector<128x128xi1>, vector<128x128xf32>
    %c0_6 = arith.constant 0 : index
    %c0_7 = arith.constant 0 : index
    %10 = vector.load %arg8[%c0_6, %c0_7] : memref<16x128xf32, #tpu.memory_space<vmem>>, vector<16x128xf32>
    %cst_8 = arith.constant dense<0.000000e+00> : vector<16x128xf32>
    %11 = tpu.matmul %3, %9, %cst_8 {dimension_numbers = #tpu.dot_dimension_numbers<[1], [1], [0], [0], [0, 0, 1, 0], [], []>} : vector<16x128xf32>, vector<128x128xf32>, vector<16x128xf32> -> vector<16x128xf32>
    %12 = arith.addf %10, %11 : vector<16x128xf32>
    %c0_9 = arith.constant 0 : index
    %c0_10 = arith.constant 0 : index
    %13 = vector.load %arg8[%c0_9, %c0_10] : memref<16x128xf32, #tpu.memory_space<vmem>>, vector<16x128xf32>
    tpu.vector_store %arg8[%c0_9, %c0_10], %12 {strides = array<i32>} : memref<16x128xf32, #tpu.memory_space<vmem>>, vector<16x128xf32>,
    %c0_i32_11 = arith.constant 0 : i32
    %14 = arith.cmpi eq, %arg2, %c0_i32_11 : i32
    %15 = arith.extui %14 : i1 to i32
    %c0_i32_12 = arith.constant 0 : i32
    %16 = arith.cmpi ne, %15, %c0_i32_12 : i32
    scf.if %16 {
      %c0_13 = arith.constant 0 : index
      %c0_14 = arith.constant 0 : index
      %17 = vector.load %arg8[%c0_13, %c0_14] : memref<16x128xf32, #tpu.memory_space<vmem>>, vector<16x128xf32>
      %cst_15 = arith.constant 1.33333337 : f32
      %18 = vector.broadcast %cst_15 : f32 to vector<16x128xf32>
      %19 = arith.mulf %17, %18 : vector<16x128xf32>
      %c0_16 = arith.constant 0 : index
      %c0_17 = arith.constant 0 : index
      %20 = vector.load %arg6[%c0_16, %c0_17] : memref<1x128xf32, #tpu.memory_space<vmem>>, vector<1x128xf32>
      %21 = vector.broadcast %20 : vector<1x128xf32> to vector<16x128xf32>
      %22 = arith.addf %19, %21 : vector<16x128xf32>
      %c0_18 = arith.constant 0 : index
      %c0_19 = arith.constant 0 : index
      %23 = vector.load %arg7[%c0_18, %c0_19] : memref<16x128xf32, #tpu.memory_space<vmem>>, vector<16x128xf32>
      tpu.vector_store %arg7[%c0_18, %c0_19], %22 {strides = array<i32>} : memref<16x128xf32, #tpu.memory_space<vmem>>, vector<16x128xf32>,
    } else {
    }
    return
  }
  func.func @transform_0(%arg0: i32, %arg1: i32, %arg2: i32) -> (i32, i32) {
    %c0_i32 = arith.constant 0 : i32
    return %arg0, %arg2 : i32, i32
  }
  func.func @transform_1(%arg0: i32, %arg1: i32, %arg2: i32) -> (i32, i32) {
    %c0_i32 = arith.constant 0 : i32
    return %arg1, %arg2 : i32, i32
  }
  func.func @transform_2(%arg0: i32, %arg1: i32, %arg2: i32) -> (i32, i32) {
    %c0_i32 = arith.constant 0 : i32
    return %arg1, %arg2 : i32, i32
  }
  func.func @transform_3(%arg0: i32, %arg1: i32, %arg2: i32) -> (i32, i32) {
    %c0_i32 = arith.constant 0 : i32
    %c0_i32_0 = arith.constant 0 : i32
    return %c0_i32, %arg1 : i32, i32
  }
  func.func @transform_4(%arg0: i32, %arg1: i32, %arg2: i32) -> (i32, i32) {
    %c0_i32 = arith.constant 0 : i32
    return %arg0, %arg1 : i32, i32
  }
}

</mosaic_0001>

<bundles_post_ra>
// kernel: tpu_custom_call.1
= control target key start
LH: loop header
LB: loop body
LE: loop exit
PB: predicated region body
PF: predicated region fallthrough
CT: control target
= control target key end

     0   :  { %9 = vsyncpa [#allocation4], 0  ;;  %s448_s0 = inlined_call_operand.hbm [shape: f32[16,128], index: 0, kind: input, shape index: {}]   ;;  %s449_s1 = inlined_call_operand.hbm [shape: f32[128,128], index: 1, kind: input, shape index: {}]   ;;  %s450_s2 = inlined_call_operand.hbm [shape: u32[128,128], index: 2, kind: input, shape index: {}]   ;;  %s451_s3 = inlined_call_operand.vmem [shape: f32[1,128], index: 3, kind: input, shape index: {}]   ;;  %s452_s4 = inlined_call_operand.hbm [shape: f32[16,128], index: 4, kind: output, shape index: {}]  }
   0x1   :  { %10 = vsyncpa [#allocation7], 0 }
   0x2   :  { %11 = vsyncpa [#allocation5], 0  ;;  %s29_s17 = sshll.u32 %s449_s1, 4  ;;  %s390_s18 = smov [#allocation6]   ;;  %s30_s17 = int_to_ptr.hbm [resolvable:$true] %s29_s17 }
   0x3   :  { %s31_s19 = sshll.u32 %s390_s18, 4  ;;  %s16_s22 = sshll.u32 %s448_s0, 4  ;;  %s32_s19 = int_to_ptr.vmem [resolvable:$true] %s31_s19  ;;  %s17_s22 = int_to_ptr.hbm [resolvable:$true] %s16_s22 }
   0x4   :  { %s391_s23 = smov 128   ;;  %s392_s24 = smov 8  }
   0x5   :  { %37 = dma.hbm_to_vmem [thread:$0]  %s30_s17, 2048, %s32_s19, [#allocation7], %s391_s23, %s391_s23, %s392_s24  }
   0x6   :  { %s393_s25 = smov [#allocation3]   ;;  %s42_s1 = sshll.u32 %s450_s2, 4  ;;  %s43_s1 = int_to_ptr.hbm [resolvable:$true] %s42_s1 }
   0x7   :  { %s18_s26 = sshll.u32 %s393_s25, 4  ;;  %s394_s0 = smov [#allocation8]   ;;  %s19_s26 = int_to_ptr.vmem [resolvable:$true] %s18_s26 }
   0x8   :  { %24 = dma.hbm_to_vmem [thread:$0]  %s17_s22, 256, %s19_s26, [#allocation4], %s391_s23, %s391_s23, %s392_s24  }
   0x9   :  { %s44_s29 = sshll.u32 %s394_s0, 4  ;;  %s45_s29 = int_to_ptr.vmem [resolvable:$true] %s44_s29 }
   0xa   :  { %50 = dma.hbm_to_vmem [thread:$0]  %s43_s1, 2048, %s45_s29, [#allocation7], %s391_s23, %s391_s23, %s392_s24  }
   0xb   :  { %384 = dma.done.wait [#allocation4], 256  }
   0xc   :  { %385 = vsyncadd [#allocation4], 4294967040 }
   0xd   :  { %386 = dma.done.wait [#allocation7], 4096  }
   0xe   :  { %387 = vsyncadd [#allocation7], 4294963200  ;;  %v104_v0 = vld [vmem:[#allocation8 + $0x78] sm:$0xff]  ;;  %v103_v3 = vld [vmem:[#allocation8 + $0x70] sm:$0xff]  ;;  %s395_s5 = smov [#allocation9]   ;;  %s219_s9 = sshll.u32 %s452_s4, 4  ;;  %s220_s9 = int_to_ptr.hbm [resolvable:$true] %s219_s9 }
   0xf   :  { %v88_v1 = vld [vmem:[#allocation6 + $0x78] sm:$0xff]  ;;  %v248_v2 = vxor.u32 2147483648, %v104_v0  ;;  %v247_v4 = vxor.u32 2147483648, %v103_v3  ;;  %v102_v5 = vld [vmem:[#allocation8 + $0x68] sm:$0xff]  ;;  %v87_v6 = vld [vmem:[#allocation6 + $0x70] sm:$0xff]  ;;  %s217_s6 = sshll.u32 %s395_s5, 4  ;;  %s218_s6 = int_to_ptr.vmem [resolvable:$true] %s217_s6 }
  0x10   :  { %v246_v7 = vxor.u32 2147483648, %v102_v5  ;;  %v101_v8 = vld [vmem:[#allocation8 + $0x60] sm:$0xff]  ;;  %v86_v9 = vld [vmem:[#allocation6 + $0x68] sm:$0xff]  ;;  %v100_v11 = vld [vmem:[#allocation8 + $0x58] sm:$0xff] }
  0x11   :  { %vm152_vm0 = vcmp.ge.s32.totalorder %v248_v2, 3221225472  ;;  %vm149_vm1 = vcmp.ge.s32.totalorder %v247_v4, 3221225472  ;;  %v245_v10 = vxor.u32 2147483648, %v101_v8  ;;  %v85_v12 = vld [vmem:[#allocation6 + $0x60] sm:$0xff]  ;;  %v244_v13 = vxor.u32 2147483648, %v100_v11  ;;  %v99_v14 = vld [vmem:[#allocation8 + $0x50] sm:$0xff] }
  0x12   :  { %249 = vmatpush.xpose.msk.msra.mxu0 %vm152_vm0, %v88_v1  ;;  %265 = vmatpush.xpose.msk.msra.mxu1 %vm152_vm0, %v88_v1  ;;  %vm146_vm2 = vcmp.ge.s32.totalorder %v246_v7, 3221225472  ;;  %v84_v15 = vld [vmem:[#allocation6 + $0x58] sm:$0xff]  ;;  %v243_v16 = vxor.u32 2147483648, %v99_v14  ;;  %v98_v17 = vld [vmem:[#allocation8 + $0x48] sm:$0xff]  ;;  %v83_v18 = vld [vmem:[#allocation6 + $0x50] sm:$0xff] }
  0x13   :  { %vm143_vm3 = vcmp.ge.s32.totalorder %v245_v10, 3221225472  ;;  %vm140_vm4 = vcmp.ge.s32.totalorder %v244_v13, 3221225472  ;;  %v242_v19 = vxor.u32 2147483648, %v98_v17  ;;  %v97_v20 = vld [vmem:[#allocation8 + $0x40] sm:$0xff]  ;;  %v82_v21 = vld [vmem:[#allocation6 + $0x48] sm:$0xff]  ;;  %v96_v23 = vld [vmem:[#allocation8 + $0x38] sm:$0xff] }
  0x14   :  { %vm137_vm5 = vcmp.ge.s32.totalorder %v243_v16, 3221225472  ;;  %v241_v22 = vxor.u32 2147483648, %v97_v20  ;;  %v81_v24 = vld [vmem:[#allocation6 + $0x40] sm:$0xff]  ;;  %v240_v25 = vxor.u32 2147483648, %v96_v23  ;;  %v95_v26 = vld [vmem:[#allocation8 + $0x30] sm:$0xff]  ;;  %v80_v27 = vld [vmem:[#allocation6 + $0x38] sm:$0xff] }
  0x15   :  { %vm134_vm6 = vcmp.ge.s32.totalorder %v242_v19, 3221225472  ;;  %v239_v28 = vxor.u32 2147483648, %v95_v26  ;;  %v94_v29 = vld [vmem:[#allocation8 + $0x28] sm:$0xff]  ;;  %v79_v30 = vld [vmem:[#allocation6 + $0x30] sm:$0xff]  ;;  %v93_v32 = vld [vmem:[#allocation8 + $0x20] sm:$0xff] }
  0x16   :  { %250 = vmatpush.xpose.msk.msra.mxu0 %vm149_vm1, %v87_v6  ;;  %266 = vmatpush.xpose.msk.msra.mxu1 %vm149_vm1, %v87_v6  ;;  %vm131_vm7 = vcmp.ge.s32.totalorder %v241_v22, 3221225472  ;;  %vm128_vm8 = vcmp.ge.s32.totalorder %v240_v25, 3221225472  ;;  %v238_v31 = vxor.u32 2147483648, %v94_v29  ;;  %v78_v33 = vld [vmem:[#allocation6 + $0x28] sm:$0xff]  ;;  %v237_v34 = vxor.u32 2147483648, %v93_v32  ;;  %v92_v35 = vld [vmem:[#allocation8 + $0x18] sm:$0xff] }
  0x17   :  { %vm125_vm9 = vcmp.ge.s32.totalorder %v239_v28, 3221225472  ;;  %v77_v36 = vld [vmem:[#allocation6 + $0x20] sm:$0xff]  ;;  %v236_v37 = vxor.u32 2147483648, %v92_v35  ;;  %v91_v38 = vld [vmem:[#allocation8 + $0x10] sm:$0xff]  ;;  %v76_v39 = vld [vmem:[#allocation6 + $0x18] sm:$0xff] }
  0x18   :  { %vm122_vm10 = vcmp.ge.s32.totalorder %v238_v31, 3221225472  ;;  %vm119_vm11 = vcmp.ge.s32.totalorder %v237_v34, 3221225472  ;;  %v235_v40 = vxor.u32 2147483648, %v91_v38  ;;  %v90_v41 = vld [vmem:[#allocation8 + $0x8] sm:$0xff]  ;;  %v75_v42 = vld [vmem:[#allocation6 + $0x10] sm:$0xff]  ;;  %v89_v44 = vld [vmem:[#allocation8] sm:$0xff] }
  0x19   :  { %vm116_vm12 = vcmp.ge.s32.totalorder %v236_v37, 3221225472  ;;  %v234_v43 = vxor.u32 2147483648, %v90_v41  ;;  %v74_v45 = vld [vmem:[#allocation6 + $0x8] sm:$0xff]  ;;  %v233_v46 = vxor.u32 2147483648, %v89_v44  ;;  %v73_v47 = vld [vmem:[#allocation6] sm:$0xff]  ;;  %v71_v48 = vld [vmem:[#allocation3] sm:$0xff] }
  0x1a   :  { %251 = vmatpush.xpose.msk.msra.mxu0 %vm146_vm2, %v86_v9  ;;  %267 = vmatpush.xpose.msk.msra.mxu1 %vm146_vm2, %v86_v9  ;;  %vm113_vm13 = vcmp.ge.s32.totalorder %v235_v40, 3221225472  ;;  %v72_v49 = vld [vmem:[#allocation3 + $0x8] sm:$0xff]  ;;  %v287_v50 = vld [vmem:[%s451_s3] ss:$0 sm:$0xff] }
  0x1b   :  { %vm110_vm14 = vcmp.ge.s32.totalorder %v234_v43, 3221225472  ;;  %vm107_vm15 = vcmp.ge.s32.totalorder %v233_v46, 3221225472 }
  0x1e   :  { %252 = vmatpush.xpose.msk.msra.mxu0 %vm143_vm3, %v85_v12  ;;  %268 = vmatpush.xpose.msk.msra.mxu1 %vm143_vm3, %v85_v12 }
  0x22   :  { %253 = vmatpush.xpose.msk.msra.mxu0 %vm140_vm4, %v84_v15  ;;  %269 = vmatpush.xpose.msk.msra.mxu1 %vm140_vm4, %v84_v15 }
  0x26   :  { %254 = vmatpush.xpose.msk.msra.mxu0 %vm137_vm5, %v83_v18  ;;  %270 = vmatpush.xpose.msk.msra.mxu1 %vm137_vm5, %v83_v18 }
  0x2a   :  { %255 = vmatpush.xpose.msk.msra.mxu0 %vm134_vm6, %v82_v21  ;;  %271 = vmatpush.xpose.msk.msra.mxu1 %vm134_vm6, %v82_v21 }
  0x2e   :  { %256 = vmatpush.xpose.msk.msra.mxu0 %vm131_vm7, %v81_v24  ;;  %272 = vmatpush.xpose.msk.msra.mxu1 %vm131_vm7, %v81_v24 }
  0x32   :  { %257 = vmatpush.xpose.msk.msra.mxu0 %vm128_vm8, %v80_v27  ;;  %273 = vmatpush.xpose.msk.msra.mxu1 %vm128_vm8, %v80_v27 }
  0x36   :  { %258 = vmatpush.xpose.msk.msra.mxu0 %vm125_vm9, %v79_v30  ;;  %274 = vmatpush.xpose.msk.msra.mxu1 %vm125_vm9, %v79_v30 }
  0x3a   :  { %259 = vmatpush.xpose.msk.msra.mxu0 %vm122_vm10, %v78_v33  ;;  %275 = vmatpush.xpose.msk.msra.mxu1 %vm122_vm10, %v78_v33 }
  0x3e   :  { %260 = vmatpush.xpose.msk.msra.mxu0 %vm119_vm11, %v77_v36  ;;  %276 = vmatpush.xpose.msk.msra.mxu1 %vm119_vm11, %v77_v36 }
  0x42   :  { %261 = vmatpush.xpose.msk.msra.mxu0 %vm116_vm12, %v76_v39  ;;  %277 = vmatpush.xpose.msk.msra.mxu1 %vm116_vm12, %v76_v39 }
  0x46   :  { %262 = vmatpush.xpose.msk.msra.mxu0 %vm113_vm13, %v75_v42  ;;  %278 = vmatpush.xpose.msk.msra.mxu1 %vm113_vm13, %v75_v42 }
  0x4a   :  { %263 = vmatpush.xpose.msk.msra.mxu0 %vm110_vm14, %v74_v45  ;;  %279 = vmatpush.xpose.msk.msra.mxu1 %vm110_vm14, %v74_v45 }
  0x4e   :  { %264 = vmatpush.xpose.msk.msra.mxu0 %vm107_vm15, %v73_v47  ;;  %280 = vmatpush.xpose.msk.msra.mxu1 %vm107_vm15, %v73_v47 }
  0x51   :  { %187 = vmatmul.f32.vlgmr.msra.gmra.mxu0 %v71_v48  ;;  %190 = vmatmul.f32.vlgmr.msra.gmra.mxu1 %v72_v49 }
  0xce   :  { %v188_v51 = vpop.f32.mrf.mxu0  ;;  %v191_v52 = vpop.f32.mrf.mxu1 }
  0xcf   :  { %v203_v53 = vmul.f32 1.3333334, %v188_v51  ;;  %v204_v54 = vmul.f32 1.3333334, %v191_v52 }
  0xd1   :  { %v209_v55 = vadd.f32 %v287_v50, %v203_v53  ;;  %v210_v56 = vadd.f32 %v287_v50, %v204_v54 }
  0xd3   :  { %211 = vst [vmem:[#allocation9] sm:$0xff] %v209_v55 }
  0xd4   :  { %212 = vst [vmem:[#allocation9 + $0x8] sm:$0xff] %v210_v56 }
  0xd5   :  { %225 = dma.vmem_to_hbm [thread:$0]  %s218_s6, 256, %s220_s9, [#allocation5], %s391_s23, %s391_s23, %s392_s24  }
  0xd6   :  { %388 = dma.done.wait [#allocation5], 256  }
  0xd7   :  { %389 = vsyncadd [#allocation5], 4294967040 }
  0xd8   :  { %230 = vsyncpa [#allocation4], 1 }
  0xd9   :  { %231 = vsyncpa [#allocation7], 1 }
  0xda   :  { %232 = vsyncpa [#allocation5], 1 }

</bundles_post_ra>
